<compile_context>
chip_gen: v6e
topology: v6e:2x2x1
jax: 0.10.0
libtpu: 0.0.40
codegen_flags: <defaults>
</compile_context>

<pallas_src>
import functools

import jax
import jax.numpy as jnp
from jax.experimental import pallas as pl
from jax.experimental.pallas import tpu as pltpu

EPS = 1e-5
LANES = 128           # padded feature width (lane-dense everywhere)
W1_ROWS = 16          # layer_1 contraction dim (true K)
W2_OFF = 16           # layer_2 slab offset (K padded to 128)
W3_OFF = 16 + 128     # layer_out slab offset (K padded to 128)
W_ROWS = 16 + 128 + 128  # 272 total slab rows (multiple of 8)


def _mlp_kernel(x_ref, w_ref, v_ref, o_ref, *, n_valid):
    """x_ref: (Bp, 16), w_ref: (272, 128), v_ref: (8, 128), o_ref: (Bp, 128)."""
    x = x_ref[...]                      # (Bp, 16)
    v = v_ref[...]                      # (8, 128) -- all small per-layer vectors
    bp = x.shape[0]
    inv_n = 1.0 / float(n_valid)

    b1, g1, be1 = v[0:1, :], v[1:2, :], v[2:3, :]
    b2, g2, be2 = v[3:4, :], v[4:5, :], v[5:6, :]
    b3 = v[6:7, :]

    # Row-mask row-vector for the BN reductions: 1 for real rows, 0 for batch
    # padding.  Static decision -- when the batch wasn't padded it is all-ones.
    if n_valid == bp:
        rm = jnp.ones((1, bp), jnp.float32)
    else:
        cols = jax.lax.broadcasted_iota(jnp.int32, (1, bp), 1)
        rm = (cols < n_valid).astype(jnp.float32)

    def batchnorm(h, gamma, beta):
        # MXU-side masked reductions (the MXU is idle between layer matmuls):
        # sum and sum-of-squares over valid rows as row-vector matmuls.
        s = jnp.dot(rm, h, preferred_element_type=jnp.float32)        # (1, 128)
        ss = jnp.dot(rm, h * h, preferred_element_type=jnp.float32)   # (1, 128)
        mean = s * inv_n
        var = jnp.maximum(ss * inv_n - mean * mean, 0.0)   # biased variance
        scale = gamma * jax.lax.rsqrt(var + EPS)            # EUP rsqrt, folded
        shift = beta - mean * scale
        return h * scale + shift

    # ----- layer_1 (K=16) + ReLU + batchnorm1 -----
    h = jnp.dot(x, w_ref[0:W1_ROWS, :], preferred_element_type=jnp.float32) + b1
    h = jnp.maximum(h, 0.0)
    h = batchnorm(h, g1, be1)

    # ----- layer_2 (K padded to 128; h lanes 64: are exactly 0) -----
    h = jnp.dot(h, w_ref[W2_OFF:W2_OFF + LANES, :],
                preferred_element_type=jnp.float32) + b2
    h = jnp.maximum(h, 0.0)
    h = batchnorm(h, g2, be2)

    # ----- layer_out (lane-dense (Bp, 128) store; cols 15: are exactly 0) -----
    o_ref[...] = jnp.dot(h, w_ref[W3_OFF:W3_OFF + LANES, :],
                         preferred_element_type=jnp.float32) + b3


def pack_params(params):
    """Pack raw params into the two kernel slabs.  Call ONCE at init."""
    (w1, b1, g1, be1, w2, b2, g2, be2, w3, b3) = params

    # One zero-padded (272, 128) weight slab: w1 (K=16), w2/w3 (K padded to 128).
    W = jnp.zeros((W_ROWS, LANES), jnp.float32)
    W = W.at[0:16, 0:64].set(w1)
    W = W.at[W2_OFF:W2_OFF + 64, 0:32].set(w2)
    W = W.at[W3_OFF:W3_OFF + 32, 0:15].set(w3)

    # One (8, 128) slab (one vreg) holding all biases / gammas / betas.
    V = jnp.zeros((8, LANES), jnp.float32)
    V = V.at[0, :64].set(b1)
    V = V.at[1, :64].set(g1)
    V = V.at[2, :64].set(be1)
    V = V.at[3, :32].set(b2)
    V = V.at[4, :32].set(g2)
    V = V.at[5, :32].set(be2)
    V = V.at[6, :15].set(b3)
    return W, V


def neural_network_forward(x, w_packed, v_packed):
    """x: (B, 16) float32, packed params from pack_params. Returns (B, 15)."""
    B = x.shape[0]
    if B == 0:  # guard: empty batch would divide by zero in BN
        return jnp.zeros((0, 15), jnp.float32)

    Bp = ((B + 7) // 8) * 8  # pad batch rows to the f32 sublane tile
    if Bp != B:
        x = jnp.pad(x, ((0, Bp - B), (0, 0)))  # tiny: only (Bp-B) x 16 zeros

    kernel = functools.partial(_mlp_kernel, n_valid=B)

    # Explicit, generation-safe VMEM budget (inputs + output + live temporaries).
    est = (2 * Bp * 16 * 4          # x
           + 2 * W_ROWS * LANES * 4  # weight slab
           + 2 * 8 * LANES * 4       # vector slab
           + 2 * Bp * LANES * 4      # output
           + 8 * Bp * LANES * 4      # live f32 temporaries (h, h*h, ...)
           + (2 << 20))              # headroom
    vmem_limit = min(max(est, 16 * 1024 * 1024), 64 * 1024 * 1024)

    out = pl.pallas_call(
        kernel,
        out_shape=jax.ShapeDtypeStruct((Bp, LANES), jnp.float32),
        grid=(),
        in_specs=[
            pl.BlockSpec((Bp, 16), lambda: (0, 0)),        # full-array last dim
            pl.BlockSpec((W_ROWS, LANES), lambda: (0, 0)),
            pl.BlockSpec((8, LANES), lambda: (0, 0)),
        ],
        out_specs=pl.BlockSpec((Bp, LANES), lambda: (0, 0)),
        compiler_params=pltpu.CompilerParams(vmem_limit_bytes=vmem_limit),
    )(x, w_packed, v_packed)

    # Tiny un-pad so the public API matches nn.Module (B, 15); consumers that
    # can take the padded (Bp, 128) block may use `out` directly.
    return out[:B, :15]


def init_params(key):
    """Deterministic init mimicking PyTorch Linear default U(-1/sqrt(fan_in), +).
    Linear weights stored pre-transposed as (in, out)."""
    ks = jax.random.split(key, 6)

    def linear(kw, kb, fan_in, fan_out):
        bound = 1.0 / jnp.sqrt(float(fan_in))
        w = jax.random.uniform(kw, (fan_in, fan_out), jnp.float32, -bound, bound)
        b = jax.random.uniform(kb, (fan_out,), jnp.float32, -bound, bound)
        return w, b

    w1, b1 = linear(ks[0], ks[1], 16, 64)
    w2, b2 = linear(ks[2], ks[3], 64, 32)
    w3, b3 = linear(ks[4], ks[5], 32, 15)
    # BatchNorm affine params at PyTorch init: weight=1, bias=0
    g1, be1 = jnp.ones((64,), jnp.float32), jnp.zeros((64,), jnp.float32)
    g2, be2 = jnp.ones((32,), jnp.float32), jnp.zeros((32,), jnp.float32)
    return (w1, b1, g1, be1, w2, b2, g2, be2, w3, b3)


def _reference_forward(x, params):
    """Pure-JAX reference with identical (training-mode BN) semantics.
    Note: running_mean/running_var buffer updates are intentionally not modeled."""
    (w1, b1, g1, be1, w2, b2, g2, be2, w3, b3) = params
    h = jnp.maximum(x @ w1 + b1, 0.0)
    m, v = h.mean(0), ((h - h.mean(0)) ** 2).mean(0)
    h = (h - m) / jnp.sqrt(v + EPS) * g1 + be1
    h = jnp.maximum(h @ w2 + b2, 0.0)
    m, v = h.mean(0), ((h - h.mean(0)) ** 2).mean(0)
    h = (h - m) / jnp.sqrt(v + EPS) * g2 + be2
    return h @ w3 + b3


if __name__ == "__main__":
    key = jax.random.PRNGKey(0)
    k_param, k_x = jax.random.split(key)

    params = init_params(k_param)
    W_packed, V_packed = pack_params(params)   # packed ONCE, reused every call
    fwd = jax.jit(neural_network_forward)

    # Case 1: batch already a multiple of the sublane tile (B = 8).
    B = 8
    x = jax.random.normal(k_x, (B, 16), jnp.float32)
    out = fwd(x, W_packed, V_packed)
    jax.block_until_ready(out)
    ref = _reference_forward(x, params)
    assert out.shape == (B, 15), out.shape
    assert jnp.allclose(out, ref, atol=1e-4, rtol=1e-4), float(
        jnp.max(jnp.abs(out - ref)))

    # Case 2: ragged batch (B = 6) exercising the padded-row masked-BN path.
    B2 = 6
    x2 = jax.random.normal(jax.random.PRNGKey(1), (B2, 16), jnp.float32)
    out2 = fwd(x2, W_packed, V_packed)
    jax.block_until_ready(out2)
    ref2 = _reference_forward(x2, params)
    assert out2.shape == (B2, 15), out2.shape
    assert jnp.allclose(out2, ref2, atol=1e-4, rtol=1e-4), float(
        jnp.max(jnp.abs(out2 - ref2)))

    print("KERNEL_OK")
</pallas_src>

<mosaic_0001>
module attributes {stable_mosaic.version = 11 : i64} {
  func.func @_mlp_kernel(%arg0: memref<8x16xf32, #tpu.memory_space<vmem>>, %arg1: memref<272x128xf32, #tpu.memory_space<vmem>>, %arg2: memref<8x128xf32, #tpu.memory_space<vmem>>, %arg3: memref<8x128xf32, #tpu.memory_space<vmem>>) attributes {dimension_semantics = [], scalar_prefetch = 0 : i64, scratch_operands = 0 : i64, tpu.core_type = #tpu.core_type<tc>} {
    %c0 = arith.constant 0 : index
    %c0_0 = arith.constant 0 : index
    %0 = vector.load %arg0[%c0, %c0_0] : memref<8x16xf32, #tpu.memory_space<vmem>>, vector<8x16xf32>
    %c0_1 = arith.constant 0 : index
    %c0_2 = arith.constant 0 : index
    %1 = vector.load %arg2[%c0_1, %c0_2] : memref<8x128xf32, #tpu.memory_space<vmem>>, vector<8x128xf32>
    %2 = vector.extract_strided_slice %1 {offsets = [0, 0], sizes = [1, 128], strides = [1, 1]} : vector<8x128xf32> to vector<1x128xf32>
    %3 = vector.extract_strided_slice %1 {offsets = [1, 0], sizes = [1, 128], strides = [1, 1]} : vector<8x128xf32> to vector<1x128xf32>
    %4 = vector.extract_strided_slice %1 {offsets = [2, 0], sizes = [1, 128], strides = [1, 1]} : vector<8x128xf32> to vector<1x128xf32>
    %5 = vector.extract_strided_slice %1 {offsets = [3, 0], sizes = [1, 128], strides = [1, 1]} : vector<8x128xf32> to vector<1x128xf32>
    %6 = vector.extract_strided_slice %1 {offsets = [4, 0], sizes = [1, 128], strides = [1, 1]} : vector<8x128xf32> to vector<1x128xf32>
    %7 = vector.extract_strided_slice %1 {offsets = [5, 0], sizes = [1, 128], strides = [1, 1]} : vector<8x128xf32> to vector<1x128xf32>
    %8 = vector.extract_strided_slice %1 {offsets = [6, 0], sizes = [1, 128], strides = [1, 1]} : vector<8x128xf32> to vector<1x128xf32>
    %cst = arith.constant 1.000000e+00 : f32
    %9 = vector.broadcast %cst : f32 to vector<1x8xf32>
    %c0_3 = arith.constant 0 : index
    %c0_4 = arith.constant 0 : index
    %10 = vector.load %arg1[%c0_3, %c0_4] : memref<272x128xf32, #tpu.memory_space<vmem>>, vector<16x128xf32>
    %cst_5 = arith.constant dense<0.000000e+00> : vector<8x128xf32>
    %11 = tpu.matmul %0, %10, %cst_5 {dimension_numbers = #tpu.dot_dimension_numbers<[1], [0], [0], [1], [0, 0, 1, 1], [], []>} : vector<8x16xf32>, vector<16x128xf32>, vector<8x128xf32> -> vector<8x128xf32>
    %12 = vector.broadcast %2 : vector<1x128xf32> to vector<8x128xf32>
    %13 = arith.addf %11, %12 : vector<8x128xf32>
    %cst_6 = arith.constant 0.000000e+00 : f32
    %14 = vector.broadcast %cst_6 : f32 to vector<8x128xf32>
    %15 = arith.maximumf %13, %14 : vector<8x128xf32>
    %cst_7 = arith.constant dense<0.000000e+00> : vector<1x128xf32>
    %16 = tpu.matmul %9, %15, %cst_7 {dimension_numbers = #tpu.dot_dimension_numbers<[1], [0], [0], [1], [0, 0, 1, 1], [], []>} : vector<1x8xf32>, vector<8x128xf32>, vector<1x128xf32> -> vector<1x128xf32>
    %17 = arith.mulf %15, %15 : vector<8x128xf32>
    %cst_8 = arith.constant dense<0.000000e+00> : vector<1x128xf32>
    %18 = tpu.matmul %9, %17, %cst_8 {dimension_numbers = #tpu.dot_dimension_numbers<[1], [0], [0], [1], [0, 0, 1, 1], [], []>} : vector<1x8xf32>, vector<8x128xf32>, vector<1x128xf32> -> vector<1x128xf32>
    %cst_9 = arith.constant 1.250000e-01 : f32
    %19 = vector.broadcast %cst_9 : f32 to vector<1x128xf32>
    %20 = arith.mulf %16, %19 : vector<1x128xf32>
    %cst_10 = arith.constant 1.250000e-01 : f32
    %21 = vector.broadcast %cst_10 : f32 to vector<1x128xf32>
    %22 = arith.mulf %18, %21 : vector<1x128xf32>
    %23 = arith.mulf %20, %20 : vector<1x128xf32>
    %24 = arith.subf %22, %23 : vector<1x128xf32>
    %cst_11 = arith.constant 0.000000e+00 : f32
    %25 = vector.broadcast %cst_11 : f32 to vector<1x128xf32>
    %26 = arith.maximumf %24, %25 : vector<1x128xf32>
    %cst_12 = arith.constant 9.99999974E-6 : f32
    %27 = vector.broadcast %cst_12 : f32 to vector<1x128xf32>
    %28 = arith.addf %26, %27 : vector<1x128xf32>
    %29 = math.rsqrt %28 : vector<1x128xf32>
    %30 = arith.mulf %3, %29 : vector<1x128xf32>
    %31 = arith.mulf %20, %30 : vector<1x128xf32>
    %32 = arith.subf %4, %31 : vector<1x128xf32>
    %33 = vector.broadcast %30 : vector<1x128xf32> to vector<8x128xf32>
    %34 = arith.mulf %15, %33 : vector<8x128xf32>
    %35 = vector.broadcast %32 : vector<1x128xf32> to vector<8x128xf32>
    %36 = arith.addf %34, %35 : vector<8x128xf32>
    %c16 = arith.constant 16 : index
    %c0_13 = arith.constant 0 : index
    %37 = vector.load %arg1[%c16, %c0_13] : memref<272x128xf32, #tpu.memory_space<vmem>>, vector<128x128xf32>
    %cst_14 = arith.constant dense<0.000000e+00> : vector<8x128xf32>
    %38 = tpu.matmul %36, %37, %cst_14 {dimension_numbers = #tpu.dot_dimension_numbers<[1], [0], [0], [1], [0, 0, 1, 1], [], []>} : vector<8x128xf32>, vector<128x128xf32>, vector<8x128xf32> -> vector<8x128xf32>
    %39 = vector.broadcast %5 : vector<1x128xf32> to vector<8x128xf32>
    %40 = arith.addf %38, %39 : vector<8x128xf32>
    %cst_15 = arith.constant 0.000000e+00 : f32
    %41 = vector.broadcast %cst_15 : f32 to vector<8x128xf32>
    %42 = arith.maximumf %40, %41 : vector<8x128xf32>
    %cst_16 = arith.constant dense<0.000000e+00> : vector<1x128xf32>
    %43 = tpu.matmul %9, %42, %cst_16 {dimension_numbers = #tpu.dot_dimension_numbers<[1], [0], [0], [1], [0, 0, 1, 1], [], []>} : vector<1x8xf32>, vector<8x128xf32>, vector<1x128xf32> -> vector<1x128xf32>
    %44 = arith.mulf %42, %42 : vector<8x128xf32>
    %cst_17 = arith.constant dense<0.000000e+00> : vector<1x128xf32>
    %45 = tpu.matmul %9, %44, %cst_17 {dimension_numbers = #tpu.dot_dimension_numbers<[1], [0], [0], [1], [0, 0, 1, 1], [], []>} : vector<1x8xf32>, vector<8x128xf32>, vector<1x128xf32> -> vector<1x128xf32>
    %cst_18 = arith.constant 1.250000e-01 : f32
    %46 = vector.broadcast %cst_18 : f32 to vector<1x128xf32>
    %47 = arith.mulf %43, %46 : vector<1x128xf32>
    %cst_19 = arith.constant 1.250000e-01 : f32
    %48 = vector.broadcast %cst_19 : f32 to vector<1x128xf32>
    %49 = arith.mulf %45, %48 : vector<1x128xf32>
    %50 = arith.mulf %47, %47 : vector<1x128xf32>
    %51 = arith.subf %49, %50 : vector<1x128xf32>
    %cst_20 = arith.constant 0.000000e+00 : f32
    %52 = vector.broadcast %cst_20 : f32 to vector<1x128xf32>
    %53 = arith.maximumf %51, %52 : vector<1x128xf32>
    %cst_21 = arith.constant 9.99999974E-6 : f32
    %54 = vector.broadcast %cst_21 : f32 to vector<1x128xf32>
    %55 = arith.addf %53, %54 : vector<1x128xf32>
    %56 = math.rsqrt %55 : vector<1x128xf32>
    %57 = arith.mulf %6, %56 : vector<1x128xf32>
    %58 = arith.mulf %47, %57 : vector<1x128xf32>
    %59 = arith.subf %7, %58 : vector<1x128xf32>
    %60 = vector.broadcast %57 : vector<1x128xf32> to vector<8x128xf32>
    %61 = arith.mulf %42, %60 : vector<8x128xf32>
    %62 = vector.broadcast %59 : vector<1x128xf32> to vector<8x128xf32>
    %63 = arith.addf %61, %62 : vector<8x128xf32>
    %c144 = arith.constant 144 : index
    %c0_22 = arith.constant 0 : index
    %64 = vector.load %arg1[%c144, %c0_22] : memref<272x128xf32, #tpu.memory_space<vmem>>, vector<128x128xf32>
    %cst_23 = arith.constant dense<0.000000e+00> : vector<8x128xf32>
    %65 = tpu.matmul %63, %64, %cst_23 {dimension_numbers = #tpu.dot_dimension_numbers<[1], [0], [0], [1], [0, 0, 1, 1], [], []>} : vector<8x128xf32>, vector<128x128xf32>, vector<8x128xf32> -> vector<8x128xf32>
    %66 = vector.broadcast %8 : vector<1x128xf32> to vector<8x128xf32>
    %67 = arith.addf %65, %66 : vector<8x128xf32>
    %c0_24 = arith.constant 0 : index
    %c0_25 = arith.constant 0 : index
    %68 = vector.load %arg3[%c0_24, %c0_25] : memref<8x128xf32, #tpu.memory_space<vmem>>, vector<8x128xf32>
    tpu.vector_store %arg3[%c0_24, %c0_25], %67 {strides = array<i32>} : memref<8x128xf32, #tpu.memory_space<vmem>>, vector<8x128xf32>,
    return
  }
}

</mosaic_0001>

<bundles_post_ra>
// kernel: neural_network_forward.1
= control target key start
LH: loop header
LB: loop body
LE: loop exit
PB: predicated region body
PF: predicated region fallthrough
CT: control target
= control target key end

     0   :  { %8 = vsyncpa [#allocation3], 0  ;;  %s1054_s0 = inlined_call_operand.hbm [shape: f32[8,16], index: 0, kind: input, shape index: {}]   ;;  %s1055_s1 = inlined_call_operand.hbm [shape: f32[272,128], index: 1, kind: input, shape index: {}]   ;;  %s1056_s2 = inlined_call_operand.hbm [shape: f32[8,128], index: 2, kind: input, shape index: {}]   ;;  %s1057_s3 = inlined_call_operand.hbm [shape: f32[8,128], index: 3, kind: output, shape index: {}]  }
   0x1   :  { %9 = vsyncpa [#allocation6], 0 }
   0x2   :  { %10 = vsyncpa [#allocation4], 0  ;;  %s923_s12 = smov [#allocation5]  }
   0x3   :  { %s26_s13 = sshll.u32 %s923_s12, 4  ;;  %s27_s13 = int_to_ptr.vmem [resolvable:$true] %s26_s13 }
   0x4   :  { %s845_s14 = scalar_lea.vmem %s27_s13, 4352  ;;  %p850_p1 = scmp.lt.s32.totalorder %s27_s13, %s27_s13 }
   0x5   :  { %p846_p0 = scmp.ne.s32.totalorder %s27_s13, %s845_s14  ;;  %p851_p2 = scmp.lt.s32.totalorder %s845_s14, %s845_s14 }
   0x7   :  { %p852_p3 = por %p851_p2, %p850_p1 }
   0x9   :  { %p853_p4 = pnand %p852_p3, %p846_p0 }
   0xb   :  { %856 = shalt.err (!%p853_p4)
}
   0xc   :  { %s924_s15 = smov 128   ;;  %s925_s16 = smov 8  }
   0xd   :  { %32 = dma.hbm_to_vmem [thread:$0]  %s1055_s1, 4352, %s27_s13, [#allocation6], %s924_s15, %s924_s15, %s925_s16  }
   0xe   :  { %s926_s19 = smov [#allocation2]   ;;  %s927_s21 = smov [#allocation7]  }
   0xf   :  { %s17_s20 = sshll.u32 %s926_s19, 4  ;;  %s39_s22 = sshll.u32 %s927_s21, 4  ;;  %s18_s20 = int_to_ptr.vmem [resolvable:$true] %s17_s20  ;;  %s40_s22 = int_to_ptr.vmem [resolvable:$true] %s39_s22 }
  0x10   :  { %s865_s23 = scalar_lea.vmem %s18_s20, 128  ;;  %p870_p6 = scmp.lt.s32.totalorder %s18_s20, %s18_s20 }
  0x11   :  { %p866_p5 = scmp.ne.s32.totalorder %s18_s20, %s865_s23  ;;  %p871_p7 = scmp.lt.s32.totalorder %s865_s23, %s865_s23 }
  0x13   :  { %p872_p8 = por %p871_p7, %p870_p6 }
  0x15   :  { %p873_p9 = pnand %p872_p8, %p866_p5 }
  0x17   :  { %876 = shalt.err (!%p873_p9)
}
  0x18   :  { %20 = dma.hbm_to_vmem [thread:$0]  %s1054_s0, 128, %s18_s20, [#allocation3]  }
  0x19   :  { %s885_s26 = scalar_lea.vmem %s40_s22, 128  ;;  %p890_p11 = scmp.lt.s32.totalorder %s40_s22, %s40_s22 }
  0x1a   :  { %p886_p10 = scmp.ne.s32.totalorder %s40_s22, %s885_s26  ;;  %p891_p12 = scmp.lt.s32.totalorder %s885_s26, %s885_s26 }
  0x1c   :  { %p892_p13 = por %p891_p12, %p890_p11 }
  0x1e   :  { %p893_p0 = pnand %p892_p13, %p886_p10 }
  0x20   :  { %896 = shalt.err (!%p893_p0)
}
  0x21   :  { %42 = dma.hbm_to_vmem [thread:$0]  %s1056_s2, 128, %s40_s22, [#allocation6]  }
  0x22   :  { %917 = dma.done.wait [#allocation3], 128  }
  0x23   :  { %918 = vsyncadd [#allocation3], 4294967168 }
  0x24   :  { %919 = dma.done.wait [#allocation6], 4480  }
  0x25   :  { %920 = vsyncadd [#allocation6], 4294962816  ;;  %v928_v0 = vmov 0.0   ;;  %vm929_vm0 = vmmov 0   ;;  %v55_v1 = vld [vmem:[#allocation5 + $0x8] sm:$0xff]  ;;  %v54_v2 = vld [vmem:[#allocation5] sm:$0xff]  ;;  %v56_v4 = vlaneseq }
  0x26   :  { %727 = vmatprep.subr.mxu0 %v928_v0  ;;  %731 = vmatprep.mubr.msk.f32.mxu0 %vm929_vm0, %v928_v0  ;;  %v52_v3 = vld [vmem:[#allocation2] sm:$0xff]  ;;  %vm60_vm1 = vcmask 130048   ;;  %v974_v7 = vld [vmem:[#allocation7] sm:$0xff]  ;;  %vm135_vm2 = vcmask 64512   ;;  %v930_v14 = vmov 1.0   ;;  %v324_v15 = vld [vmem:[#allocation5 + $0x88] sm:$0xff] }
  0x27   :  { %739 = vmatprep.subr.mxu1 %v928_v0  ;;  %741 = vmatprep.mubr.msk.f32.mxu1 %vm929_vm0, %v928_v0  ;;  %v971_v5 = vshrl.u32 %v56_v4, 7  ;;  %v323_v16 = vld [vmem:[#allocation5 + $0x80] sm:$0xff]  ;;  %v322_v17 = vld [vmem:[#allocation5 + $0x78] sm:$0xff]  ;;  %v321_v18 = vld [vmem:[#allocation5 + $0x70] sm:$0xff]  ;;  %s931_s0 = smov [#allocation8]  }
  0x28   :  { %728 = vmatpush3.msra.mxu0 %v55_v1  ;;  %v320_v19 = vld [vmem:[#allocation5 + $0x68] sm:$0xff]  ;;  %v319_v20 = vld [vmem:[#allocation5 + $0x60] sm:$0xff]  ;;  %v318_v21 = vld [vmem:[#allocation5 + $0x58] sm:$0xff]  ;;  %s667_s2 = sshll.u32 %s931_s0, 4  ;;  %s668_s2 = int_to_ptr.vmem [resolvable:$true] %s667_s2 }
  0x29   :  { %729 = vmatprep.subr.mxu0 %v928_v0  ;;  %v58_v6 = vsub.s32 0, %v971_v5  ;;  %v317_v22 = vld [vmem:[#allocation5 + $0x50] sm:$0xff]  ;;  %v316_v23 = vld [vmem:[#allocation5 + $0x48] sm:$0xff]  ;;  %v315_v24 = vld [vmem:[#allocation5 + $0x40] sm:$0xff]  ;;  %v301_v45 = vsub.s32 1, %v971_v5  ;;  %v306_v49 = vsub.s32 2, %v971_v5  ;;  %p902_p2 = scmp.lt.s32.totalorder %s668_s2, %s668_s2 }
  0x2a   :  { %730 = vmatpush3.msra.mxu0 %v54_v2  ;;  %v314_v25 = vld [vmem:[#allocation5 + $0x38] sm:$0xff]  ;;  %v313_v26 = vld [vmem:[#allocation5 + $0x30] sm:$0xff]  ;;  %v312_v27 = vld [vmem:[#allocation5 + $0x28] sm:$0xff]  ;;  %v327_v54 = vsub.s32 3, %v971_v5  ;;  %s897_s28 = scalar_lea.vmem %s668_s2, 128 }
  0x2b   :  { %732 = vmatmul.mubr.msk.f32.vlgmr.msra.gmra.mxu0 %vm60_vm1, %v52_v3  ;;  %734 = vmatprep.subr.mxu0 %v928_v0  ;;  %v59_v8 = vrot.slane %v974_v7, %v58_v6  ;;  %v311_v28 = vld [vmem:[#allocation5 + $0x20] sm:$0xff]  ;;  %v310_v29 = vld [vmem:[#allocation5 + $0x18] sm:$0xff]  ;;  %v309_v30 = vld [vmem:[#allocation5 + $0x10] sm:$0xff]  ;;  %p898_p1 = scmp.ne.s32.totalorder %s668_s2, %s897_s28  ;;  %p903_p3 = scmp.lt.s32.totalorder %s897_s28, %s897_s28 }
  0x2c   :  { %736 = vmatprep.mubr.msk.f32.mxu0 %vm929_vm0, %v928_v0  ;;  %v328_v55 = vrot.slane %v974_v7, %v327_v54  ;;  %v585_v61 = vld [vmem:[#allocation5 + $0x108] sm:$0xff]  ;;  %v584_v62 = vld [vmem:[#allocation5 + $0x100] sm:$0xff]  ;;  %v583_v63 = vld [vmem:[#allocation5 + $0xf8] sm:$0xff] }
  0x2d   :  { %v582_v1 = vld [vmem:[#allocation5 + $0xf0] sm:$0xff]  ;;  %v581_v2 = vld [vmem:[#allocation5 + $0xe8] sm:$0xff]  ;;  %v580_v3 = vld [vmem:[#allocation5 + $0xe0] sm:$0xff]  ;;  %p904_p4 = por %p903_p3, %p902_p2 }
  0x2e   :  { %v579_v4 = vld [vmem:[#allocation5 + $0xd8] sm:$0xff]  ;;  %v578_v6 = vld [vmem:[#allocation5 + $0xd0] sm:$0xff] }
  0x2f   :  { %p905_p5 = pnand %p904_p4, %p898_p1 }
  0xeb   :  { %v130_v9 = vpop.f32.mrf.mxu0 }
  0xec   :  { %v131_v10 = vadd.f32 %v130_v9, %v59_v8  ;;  %v577_v8 = vld [vmem:[#allocation5 + $0xc8] sm:$0xff]  ;;  %v576_v9 = vld [vmem:[#allocation5 + $0xc0] sm:$0xff] }
  0xed   :  { %v733_v11 = vpop.f32.mrf.mxu0 }
  0xee   :  { %v977_v12 = vmax.f32 %v131_v10, 0.0  ;;  %v575_v10 = vld [vmem:[#allocation5 + $0xb8] sm:$0xff]  ;;  %v574_v11 = vld [vmem:[#allocation5 + $0xb0] sm:$0xff] }
  0xf0   :  { %735 = vmatpush3.msra.mxu0 %v977_v12  ;;  %v209_v13 = vmul.f32 %v977_v12, %v977_v12 }
  0xf1   :  { %737 = vmatmul.mubr.msk.f32.vlgmr.msra.gmra.mxu0 %vm135_vm2, %v930_v14  ;;  %744 = vmatprep.subr.mxu0 %v928_v0 }
  0xf2   :  { %740 = vmatpush3.msra.mxu1 %v209_v13  ;;  %776 = vmatprep.mubr.msk.f32.mxu0 %vm929_vm0, %v928_v0  ;;  %v572_v13 = vld [vmem:[#allocation5 + $0xa0] sm:$0xff] }
  0xf3   :  { %742 = vmatmul.mubr.msk.f32.vlgmr.msra.gmra.mxu1 %vm135_vm2, %v930_v14  ;;  %779 = vmatprep.subr.mxu1 %v928_v0 }
  0xf4   :  { %781 = vmatprep.mubr.msk.f32.mxu1 %vm929_vm0, %v928_v0  ;;  %745 = vmatpush3.msra.mxu0 %v324_v15  ;;  %v570_v15 = vld [vmem:[#allocation5 + $0x90] sm:$0xff] }
  0xf5   :  { %746 = vmatprep.subr.mxu0 %v928_v0 }
  0xf6   :  { %747 = vmatpush3.msra.mxu0 %v323_v16 }
  0xf7   :  { %748 = vmatprep.subr.mxu0 %v928_v0 }
  0xf8   :  { %749 = vmatpush3.msra.mxu0 %v322_v17 }
  0xf9   :  { %750 = vmatprep.subr.mxu0 %v928_v0 }
  0xfa   :  { %751 = vmatpush3.msra.mxu0 %v321_v18 }
  0xfb   :  { %752 = vmatprep.subr.mxu0 %v928_v0 }
  0xfc   :  { %753 = vmatpush3.msra.mxu0 %v320_v19 }
  0xfd   :  { %754 = vmatprep.subr.mxu0 %v928_v0 }
  0xfe   :  { %755 = vmatpush3.msra.mxu0 %v319_v20 }
  0xff   :  { %756 = vmatprep.subr.mxu0 %v928_v0 }
 0x100   :  { %757 = vmatpush3.msra.mxu0 %v318_v21 }
 0x101   :  { %758 = vmatprep.subr.mxu0 %v928_v0 }
 0x102   :  { %759 = vmatpush3.msra.mxu0 %v317_v22 }
 0x103   :  { %760 = vmatprep.subr.mxu0 %v928_v0 }
 0x104   :  { %761 = vmatpush3.msra.mxu0 %v316_v23 }
 0x105   :  { %762 = vmatprep.subr.mxu0 %v928_v0 }
 0x106   :  { %763 = vmatpush3.msra.mxu0 %v315_v24 }
 0x107   :  { %764 = vmatprep.subr.mxu0 %v928_v0 }
 0x108   :  { %765 = vmatpush3.msra.mxu0 %v314_v25 }
 0x109   :  { %766 = vmatprep.subr.mxu0 %v928_v0 }
 0x10a   :  { %767 = vmatpush3.msra.mxu0 %v313_v26 }
 0x10b   :  { %768 = vmatprep.subr.mxu0 %v928_v0 }
 0x10c   :  { %769 = vmatpush3.msra.mxu0 %v312_v27 }
 0x10d   :  { %770 = vmatprep.subr.mxu0 %v928_v0 }
 0x10e   :  { %771 = vmatpush3.msra.mxu0 %v311_v28 }
 0x10f   :  { %772 = vmatprep.subr.mxu0 %v928_v0 }
 0x110   :  { %773 = vmatpush3.msra.mxu0 %v310_v29 }
 0x111   :  { %774 = vmatprep.subr.mxu0 %v928_v0 }
 0x112   :  { %775 = vmatpush3.msra.mxu0 %v309_v30  ;;  %v562_v30 = vsub.s32 4, %v971_v5 }
 0x1b1   :  { %v205_v31 = vpop.f32.mrf.mxu0 }
 0x1b2   :  { %v280_v32 = vmul.f32 0.125, %v205_v31 }
 0x1b3   :  { %v738_v33 = vpop.f32.mrf.mxu0  ;;  %v276_v34 = vpop.f32.mrf.mxu1 }
 0x1b4   :  { %v282_v35 = vmul.f32 %v280_v32, %v280_v32  ;;  %v281_v36 = vmul.f32 0.125, %v276_v34  ;;  %v567_v33 = vsub.s32 5, %v971_v5 }
 0x1b5   :  { %v743_v37 = vpop.f32.mrf.mxu1 }
 0x1b6   :  { %v283_v38 = vsub.f32 %v281_v36, %v282_v35 }
 0x1b8   :  { %v284_v39 = vmax.f32 %v283_v38, 0.0  ;;  %v588_v38 = vsub.s32 6, %v971_v5 }
 0x1ba   :  { %v285_v40 = vadd.f32 1e-05, %v284_v39  ;;  %v589_v39 = vrot.slane %v974_v7, %v588_v38 }
 0x1bc   :  { %833 = vrsqrt.f32 %v285_v40 }
 0x1c9   :  { %v834_v41 = vpop.eup %833 }
 0x1ca   :  { %v288_v42 = vrot.slane %v834_v41, 7 }
 0x1cc   :  { %v290_v43 = vmul.f32 %v288_v42, %v974_v7 }
 0x1ce   :  { %v292_v44 = vrot.slane %v290_v43, 1  ;;  %v302_v48 = vrot.slane %v290_v43, %v301_v45 }
 0x1d0   :  { %v294_v46 = vmul.f32 %v292_v44, %v280_v32  ;;  %v303_v51 = vmul.f32 %v302_v48, %v977_v12  ;;  %v573_v12 = vld [vmem:[#allocation5 + $0xa8] sm:$0xff] }
 0x1d2   :  { %v296_v47 = vrot.slane %v294_v46, 6 }
 0x1d4   :  { %v298_v50 = vsub.f32 %v974_v7, %v296_v47 }
 0x1d6   :  { %v307_v52 = vrot.slane %v298_v50, %v306_v49 }
 0x1d8   :  { %v308_v53 = vadd.f32 %v307_v52, %v303_v51 }
 0x1da   :  { %777 = vmatmul.mubr.f32.vlgmr.msra.gmra.mxu0 %v308_v53 }
 0x29a   :  { %v395_v56 = vpop.f32.mrf.mxu0 }
 0x29b   :  { %v396_v57 = vadd.f32 %v395_v56, %v328_v55 }
 0x29c   :  { %v778_v58 = vpop.f32.mrf.mxu0 }
 0x29d   :  { %v1014_v59 = vmax.f32 %v396_v57, 0.0 }
 0x29f   :  { %v470_v60 = vmul.f32 %v1014_v59, %v1014_v59  ;;  %780 = vmatpush3.msra.mxu1 %v1014_v59 }
 0x2a0   :  { %782 = vmatmul.mubr.msk.f32.vlgmr.msra.gmra.mxu1 %vm135_vm2, %v930_v14  ;;  %784 = vmatprep.subr.mxu1 %v928_v0 }
 0x2a1   :  { %785 = vmatpush3.msra.mxu1 %v470_v60  ;;  %786 = vmatprep.mubr.msk.f32.mxu1 %vm929_vm0, %v928_v0 }
 0x2a2   :  { %789 = vmatprep.subr.mxu1 %v928_v0 }
 0x2a4   :  { %787 = vmatmul.mubr.msk.f32.vlgmr.msra.gmra.mxu1 %vm135_vm2, %v930_v14  ;;  %v571_v14 = vld [vmem:[#allocation5 + $0x98] sm:$0xff] }
 0x2a5   :  { %821 = vmatprep.mubr.msk.f32.mxu1 %vm929_vm0, %v928_v0  ;;  %790 = vmatpush3.msra.mxu1 %v585_v61 }
 0x2a6   :  { %791 = vmatprep.subr.mxu1 %v928_v0 }
 0x2a7   :  { %792 = vmatpush3.msra.mxu1 %v584_v62 }
 0x2a8   :  { %793 = vmatprep.subr.mxu1 %v928_v0 }
 0x2a9   :  { %794 = vmatpush3.msra.mxu1 %v583_v63 }
 0x2aa   :  { %795 = vmatprep.subr.mxu1 %v928_v0 }
 0x2ab   :  { %796 = vmatpush3.msra.mxu1 %v582_v1 }
 0x2ac   :  { %797 = vmatprep.subr.mxu1 %v928_v0 }
 0x2ad   :  { %798 = vmatpush3.msra.mxu1 %v581_v2 }
 0x2ae   :  { %799 = vmatprep.subr.mxu1 %v928_v0 }
 0x2af   :  { %800 = vmatpush3.msra.mxu1 %v580_v3 }
 0x2b0   :  { %801 = vmatprep.subr.mxu1 %v928_v0 }
 0x2b1   :  { %802 = vmatpush3.msra.mxu1 %v579_v4 }
 0x2b2   :  { %803 = vmatprep.subr.mxu1 %v928_v0 }
 0x2b3   :  { %804 = vmatpush3.msra.mxu1 %v578_v6 }
 0x2b4   :  { %805 = vmatprep.subr.mxu1 %v928_v0 }
 0x2b5   :  { %806 = vmatpush3.msra.mxu1 %v577_v8 }
 0x2b6   :  { %807 = vmatprep.subr.mxu1 %v928_v0 }
 0x2b7   :  { %808 = vmatpush3.msra.mxu1 %v576_v9 }
 0x2b8   :  { %809 = vmatprep.subr.mxu1 %v928_v0 }
 0x2b9   :  { %810 = vmatpush3.msra.mxu1 %v575_v10 }
 0x2ba   :  { %811 = vmatprep.subr.mxu1 %v928_v0 }
 0x2bb   :  { %812 = vmatpush3.msra.mxu1 %v574_v11 }
 0x2bc   :  { %813 = vmatprep.subr.mxu1 %v928_v0 }
 0x2bd   :  { %814 = vmatpush3.msra.mxu1 %v573_v12 }
 0x2be   :  { %815 = vmatprep.subr.mxu1 %v928_v0 }
 0x2bf   :  { %816 = vmatpush3.msra.mxu1 %v572_v13 }
 0x2c0   :  { %817 = vmatprep.subr.mxu1 %v928_v0 }
 0x2c1   :  { %818 = vmatpush3.msra.mxu1 %v571_v14 }
 0x2c2   :  { %819 = vmatprep.subr.mxu1 %v928_v0 }
 0x2c3   :  { %820 = vmatpush3.msra.mxu1 %v570_v15 }
 0x360   :  { %v466_v16 = vpop.f32.mrf.mxu1 }
 0x361   :  { %v541_v17 = vmul.f32 0.125, %v466_v16 }
 0x362   :  { %v783_v18 = vpop.f32.mrf.mxu1 }
 0x363   :  { %v543_v20 = vmul.f32 %v541_v17, %v541_v17 }
 0x364   :  { %v537_v19 = vpop.f32.mrf.mxu1 }
 0x365   :  { %v542_v21 = vmul.f32 0.125, %v537_v19 }
 0x366   :  { %v788_v22 = vpop.f32.mrf.mxu1 }
 0x367   :  { %v544_v23 = vsub.f32 %v542_v21, %v543_v20 }
 0x369   :  { %v545_v24 = vmax.f32 %v544_v23, 0.0 }
 0x36b   :  { %v546_v25 = vadd.f32 1e-05, %v545_v24 }
 0x36d   :  { %835 = vrsqrt.f32 %v546_v25 }
 0x37a   :  { %v836_v26 = vpop.eup %835 }
 0x37b   :  { %v549_v27 = vrot.slane %v836_v26, 4 }
 0x37d   :  { %v551_v28 = vmul.f32 %v549_v27, %v974_v7 }
 0x37f   :  { %v553_v29 = vrot.slane %v551_v28, 4  ;;  %v563_v32 = vrot.slane %v551_v28, %v562_v30 }
 0x381   :  { %v555_v0 = vmul.f32 %v553_v29, %v541_v17  ;;  %v564_v35 = vmul.f32 %v563_v32, %v1014_v59 }
 0x383   :  { %v557_v31 = vrot.slane %v555_v0, 3 }
 0x385   :  { %v559_v34 = vsub.f32 %v974_v7, %v557_v31 }
 0x387   :  { %v568_v36 = vrot.slane %v559_v34, %v567_v33 }
 0x389   :  { %v569_v37 = vadd.f32 %v568_v36, %v564_v35 }
 0x38b   :  { %822 = vmatmul.mubr.f32.vlgmr.msra.gmra.mxu1 %v569_v37 }
 0x44b   :  { %v656_v40 = vpop.f32.mrf.mxu1 }
 0x44c   :  { %v657_v41 = vadd.f32 %v656_v40, %v589_v39 }
 0x44d   :  { %v823_v42 = vpop.f32.mrf.mxu1 }
 0x44e   :  { %660 = vst [vmem:[#allocation8] sm:$0xff] %v657_v41 }
 0x44f   :  { %908 = shalt.err (!%p905_p5)
}
 0x450   :  { %670 = dma.vmem_to_hbm [thread:$0]  %s668_s2, 128, %s1057_s3, [#allocation4]  }
 0x451   :  { %921 = dma.done.wait [#allocation4], 128  }
 0x452   :  { %922 = vsyncadd [#allocation4], 4294967168 }
 0x453   :  { %674 = vsyncpa [#allocation3], 1 }
 0x454   :  { %675 = vsyncpa [#allocation6], 1 }
 0x455   :  { %676 = vsyncpa [#allocation4], 1 }

</bundles_post_ra>
